<compile_context>
chip_gen: v7x
topology: tpu7x:2x2x1
jax: 0.10.0
libtpu: 0.0.40
codegen_flags: <defaults>
</compile_context>

<pallas_src>
import functools

import jax
import jax.numpy as jnp
from jax.experimental import pallas as pl
from jax.experimental.pallas import tpu as pltpu

_LANES = 128       # pad hidden dim to a multiple of the lane width (lane-dense stores)
_MIN_CHUNK = 8     # output tile sublane granularity
_MAX_CHUNK = 64    # cap the static unroll per grid step


def _round_up(x, m):
    return ((x + m - 1) // m) * m


def _rnn_scan_body(w_rec, w_in, bias, xs_ref, out_ref, h_ref, *, nonlinearity, chunk):
    """Run `chunk` recurrence steps; h_ref (1, Hpad) persists across grid steps."""
    t0 = pl.program_id(0) * chunk
    h = h_ref[...]                                   # (1, Hpad) f32, resident in VMEM
    rows = []
    for i in range(chunk):                           # static unroll (traced once)
        x_t = xs_ref[t0 + i]                         # scalar input from SMEM
        # Scalar drive folded in SMEM-scalar math before the single broadcast.
        drive = w_in * x_t + bias
        act = jnp.tanh(h) if nonlinearity == "tanh" else jax.nn.sigmoid(h)
        # size-1 contraction == scalar scale; keep it on VPU/EUP, never the MXU.
        h = w_rec * act + drive
        rows.append(h)
    h_ref[...] = h                                   # carry state across grid steps
    out_ref[...] = jnp.concatenate(rows, axis=0)     # one unmasked (chunk, Hpad) store


def _rnn_scan_kernel_zero_h0(w_rec_ref, w_in_ref, bias_ref, xs_ref, out_ref, h_ref,
                             *, nonlinearity, chunk):
    @pl.when(pl.program_id(0) == 0)
    def _():
        # prev_state=None path: init in-kernel, no HBM zeros + DMA.
        h_ref[...] = jnp.zeros_like(h_ref)

    _rnn_scan_body(w_rec_ref[0], w_in_ref[0], bias_ref[0], xs_ref, out_ref, h_ref,
                   nonlinearity=nonlinearity, chunk=chunk)


def _rnn_scan_kernel_with_h0(w_rec_ref, w_in_ref, bias_ref, xs_ref, h0_ref, out_ref,
                             h_ref, *, nonlinearity, chunk):
    @pl.when(pl.program_id(0) == 0)
    def _():
        h_ref[...] = h0_ref[...]

    _rnn_scan_body(w_rec_ref[0], w_in_ref[0], bias_ref[0], xs_ref, out_ref, h_ref,
                   nonlinearity=nonlinearity, chunk=chunk)


def rnn_cell_scan(xs, prev_state=None, *, hidden_size, w_rec, w_in, bias,
                  nonlinearity="tanh"):
    """Fused T-step RNNCell recurrence in a single pallas_call.

    xs: (T,) f32 per-step scalar inputs.
    prev_state: None (zeros, in-kernel init) or a (hidden_size,)/(1, hidden_size) carry.
    Returns: (T, hidden_size) f32 — the state after each step.
    """
    if nonlinearity not in ("tanh", "sigmoid"):
        raise ValueError("Invalid nonlinearity selected for RNN.")
    xs = jnp.asarray(xs, jnp.float32).reshape(-1)
    T = xs.shape[0]
    h_pad = _round_up(max(hidden_size, _LANES), _LANES)

    # Chunk size: multiple of 8 sublanes, capped unroll, covers T with few steps.
    chunk = min(_MAX_CHUNK, _round_up(max(T, _MIN_CHUNK), _MIN_CHUNK))
    t_pad = _round_up(max(T, chunk), chunk)
    if t_pad != T:
        xs = jnp.pad(xs, (0, t_pad - T))

    w_rec = jnp.asarray(w_rec, jnp.float32).reshape(1)
    w_in = jnp.asarray(w_in, jnp.float32).reshape(1)
    bias = jnp.asarray(bias, jnp.float32).reshape(1)

    smem = pl.BlockSpec(memory_space=pltpu.MemorySpace.SMEM)
    in_specs = [smem, smem, smem, smem]            # W_rec, W_in, bias, xs
    args = [w_rec, w_in, bias, xs]

    if prev_state is None:
        kernel = functools.partial(_rnn_scan_kernel_zero_h0,
                                   nonlinearity=nonlinearity, chunk=chunk)
    else:
        # TODO(synk): PyTorch re-wraps prev_state via torch.tensor([prev_state])
        # (scalar-only); we accept the natural (hidden_size,) recurrent state instead.
        h0 = jnp.asarray(prev_state, jnp.float32).reshape(1, -1)
        if h0.shape[1] != hidden_size:
            raise ValueError(
                f"prev_state must have {hidden_size} elements, got {h0.shape[1]}")
        h0 = jnp.pad(h0, ((0, 0), (0, h_pad - hidden_size)))
        in_specs.append(pl.BlockSpec((1, h_pad), lambda c: (0, 0)))
        args.append(h0)
        kernel = functools.partial(_rnn_scan_kernel_with_h0,
                                   nonlinearity=nonlinearity, chunk=chunk)

    out = pl.pallas_call(
        kernel,
        out_shape=jax.ShapeDtypeStruct((t_pad, h_pad), jnp.float32),
        grid_spec=pltpu.PrefetchScalarGridSpec(
            num_scalar_prefetch=0,
            grid=(t_pad // chunk,),
            in_specs=in_specs,
            out_specs=pl.BlockSpec((chunk, h_pad), lambda c: (c, 0)),
            scratch_shapes=[pltpu.VMEM((1, h_pad), jnp.float32)],
        ),
        compiler_params=pltpu.CompilerParams(
            dimension_semantics=("arbitrary",),    # sequential recurrence
        ),
        cost_estimate=pl.CostEstimate(
            flops=3 * t_pad * h_pad,
            transcendentals=t_pad * h_pad,
            bytes_accessed=4 * (3 + t_pad + t_pad * h_pad),
        ),
    )(*args)
    return out[:T, :hidden_size]


def rnn_cell_forward(x, prev_state=None, *, hidden_size, w_rec, w_in, bias,
                     nonlinearity="tanh"):
    """Module-exact single step (PyTorch RNNCell.forward semantics)."""
    x = jnp.asarray(x, jnp.float32).reshape(-1)
    if x.shape[0] != 1:
        raise ValueError(
            f"RNNCell.forward expects a single scalar input per step, got {x.shape[0]}.")
    out = rnn_cell_scan(x, prev_state, hidden_size=hidden_size, w_rec=w_rec,
                        w_in=w_in, bias=bias, nonlinearity=nonlinearity)
    return out[0]                                  # (hidden_size,)


def _reference_scan(xs, prev_state, *, hidden_size, w_rec, w_in, bias, nonlinearity):
    xs = jnp.asarray(xs, jnp.float32).reshape(-1)
    if prev_state is None:
        h = jnp.zeros((hidden_size,), jnp.float32)
    else:
        h = jnp.asarray(prev_state, jnp.float32).reshape(-1)
    outs = []
    for t in range(xs.shape[0]):
        act = jnp.tanh(h) if nonlinearity == "tanh" else jax.nn.sigmoid(h)
        h = w_rec[0] * act + w_in[0] * xs[t] + bias[0]
        outs.append(h)
    return jnp.stack(outs, axis=0)


if __name__ == "__main__":
    hidden_size = 32
    seq_len = 8

    # Deterministic parameters, exactly as in the module's __init__.
    w_rec = jnp.array([5.0], jnp.float32)
    w_in = jnp.array([0.2], jnp.float32)
    bias = jnp.array([0.0], jnp.float32)

    key = jax.random.PRNGKey(0)
    k_x, k_h = jax.random.split(key)
    xs = jax.random.normal(k_x, (seq_len,), dtype=jnp.float32)

    # 1) Fused multi-step recurrence, prev_state=None (in-kernel zero init).
    out_scan = jax.block_until_ready(
        rnn_cell_scan(xs, None, hidden_size=hidden_size, w_rec=w_rec, w_in=w_in,
                      bias=bias, nonlinearity="tanh"))
    ref_scan = _reference_scan(xs, None, hidden_size=hidden_size, w_rec=w_rec,
                               w_in=w_in, bias=bias, nonlinearity="tanh")
    assert out_scan.shape == (seq_len, hidden_size)
    assert jnp.allclose(out_scan, ref_scan, atol=2e-5, rtol=1e-5), \
        float(jnp.max(jnp.abs(out_scan - ref_scan)))

    # 2) Module-exact single step (RNNCell.forward, prev_state=None path).
    out_step = jax.block_until_ready(
        rnn_cell_forward(xs[:1], None, hidden_size=hidden_size, w_rec=w_rec,
                         w_in=w_in, bias=bias, nonlinearity="tanh"))
    assert out_step.shape == (hidden_size,)
    assert jnp.allclose(out_step, ref_scan[0], atol=2e-5, rtol=1e-5)

    # 3) Explicit carried state + sigmoid nonlinearity.
    h0 = jax.random.normal(k_h, (hidden_size,), dtype=jnp.float32)
    out_h0 = jax.block_until_ready(
        rnn_cell_scan(xs, h0, hidden_size=hidden_size, w_rec=w_rec, w_in=w_in,
                      bias=bias, nonlinearity="sigmoid"))
    ref_h0 = _reference_scan(xs, h0, hidden_size=hidden_size, w_rec=w_rec,
                             w_in=w_in, bias=bias, nonlinearity="sigmoid")
    assert jnp.allclose(out_h0, ref_h0, atol=2e-5, rtol=1e-5)

    # 4) Longer sequence exercising multiple grid steps with the carried VMEM state.
    xs_long = jax.random.normal(k_x, (40,), dtype=jnp.float32)
    out_long = jax.block_until_ready(
        rnn_cell_scan(xs_long, None, hidden_size=hidden_size, w_rec=w_rec, w_in=w_in,
                      bias=bias, nonlinearity="tanh"))
    ref_long = _reference_scan(xs_long, None, hidden_size=hidden_size, w_rec=w_rec,
                               w_in=w_in, bias=bias, nonlinearity="tanh")
    assert jnp.allclose(out_long, ref_long, atol=2e-5, rtol=1e-5)

    print("KERNEL_OK")
</pallas_src>

<mosaic_0001>
module attributes {stable_mosaic.version = 11 : i64} {
  func.func @_rnn_scan_kernel_zero_h0(%arg0: i32, %arg1: memref<1xf32, #tpu.memory_space<smem>>, %arg2: memref<1xf32, #tpu.memory_space<smem>>, %arg3: memref<1xf32, #tpu.memory_space<smem>>, %arg4: memref<8xf32, #tpu.memory_space<smem>>, %arg5: memref<8x128xf32, #tpu.memory_space<vmem>>, %arg6: memref<1x128xf32, #tpu.memory_space<vmem>>) attributes {dimension_semantics = [#tpu.dimension_semantics<arbitrary>], iteration_bounds = array<i64: 1>, scalar_prefetch = 0 : i64, scratch_operands = 1 : i64, tpu.core_type = #tpu.core_type<tc>, window_params = [{transform_indices = @transform_0, window_bounds = array<i64: 1>}, {transform_indices = @transform_1, window_bounds = array<i64: 1>}, {transform_indices = @transform_2, window_bounds = array<i64: 1>}, {transform_indices = @transform_3, window_bounds = array<i64: 8>}, {transform_indices = @transform_4, window_bounds = array<i64: 8, 128>}]} {
    %c0_i32 = arith.constant 0 : i32
    %0 = arith.cmpi eq, %arg0, %c0_i32 : i32
    %1 = arith.extui %0 : i1 to i32
    %c0_i32_0 = arith.constant 0 : i32
    %2 = arith.cmpi ne, %1, %c0_i32_0 : i32
    scf.if %2 {
      %cst = arith.constant 0.000000e+00 : f32
      %91 = vector.broadcast %cst : f32 to vector<1x128xf32>
      %c0_10 = arith.constant 0 : index
      %c0_11 = arith.constant 0 : index
      %92 = vector.load %arg6[%c0_10, %c0_11] : memref<1x128xf32, #tpu.memory_space<vmem>>, vector<1x128xf32>
      tpu.vector_store %arg6[%c0_10, %c0_11], %91 {strides = array<i32>} : memref<1x128xf32, #tpu.memory_space<vmem>>, vector<1x128xf32>,
    } else {
    }
    %c0 = arith.constant 0 : index
    %3 = memref.load %arg1[%c0] : memref<1xf32, #tpu.memory_space<smem>>
    %c0_1 = arith.constant 0 : index
    %4 = memref.load %arg2[%c0_1] : memref<1xf32, #tpu.memory_space<smem>>
    %c0_2 = arith.constant 0 : index
    %5 = memref.load %arg3[%c0_2] : memref<1xf32, #tpu.memory_space<smem>>
    %c8_i32 = arith.constant 8 : i32
    %6 = arith.muli %arg0, %c8_i32 : i32
    %c0_3 = arith.constant 0 : index
    %c0_4 = arith.constant 0 : index
    %7 = vector.load %arg6[%c0_3, %c0_4] : memref<1x128xf32, #tpu.memory_space<vmem>>, vector<1x128xf32>
    %c0_i32_5 = arith.constant 0 : i32
    %8 = arith.addi %6, %c0_i32_5 : i32
    %9 = arith.index_cast %8 : i32 to index
    %10 = memref.load %arg4[%9] : memref<8xf32, #tpu.memory_space<smem>>
    %11 = arith.mulf %4, %10 : f32
    %12 = arith.addf %11, %5 : f32
    %13 = math.tanh %7 : vector<1x128xf32>
    %14 = vector.broadcast %3 : f32 to vector<1x128xf32>
    %15 = arith.mulf %14, %13 : vector<1x128xf32>
    %16 = vector.broadcast %12 : f32 to vector<1x128xf32>
    %17 = arith.addf %15, %16 : vector<1x128xf32>
    %c1_i32 = arith.constant 1 : i32
    %18 = arith.addi %6, %c1_i32 : i32
    %19 = arith.index_cast %18 : i32 to index
    %20 = memref.load %arg4[%19] : memref<8xf32, #tpu.memory_space<smem>>
    %21 = arith.mulf %4, %20 : f32
    %22 = arith.addf %21, %5 : f32
    %23 = math.tanh %17 : vector<1x128xf32>
    %24 = vector.broadcast %3 : f32 to vector<1x128xf32>
    %25 = arith.mulf %24, %23 : vector<1x128xf32>
    %26 = vector.broadcast %22 : f32 to vector<1x128xf32>
    %27 = arith.addf %25, %26 : vector<1x128xf32>
    %c2_i32 = arith.constant 2 : i32
    %28 = arith.addi %6, %c2_i32 : i32
    %29 = arith.index_cast %28 : i32 to index
    %30 = memref.load %arg4[%29] : memref<8xf32, #tpu.memory_space<smem>>
    %31 = arith.mulf %4, %30 : f32
    %32 = arith.addf %31, %5 : f32
    %33 = math.tanh %27 : vector<1x128xf32>
    %34 = vector.broadcast %3 : f32 to vector<1x128xf32>
    %35 = arith.mulf %34, %33 : vector<1x128xf32>
    %36 = vector.broadcast %32 : f32 to vector<1x128xf32>
    %37 = arith.addf %35, %36 : vector<1x128xf32>
    %c3_i32 = arith.constant 3 : i32
    %38 = arith.addi %6, %c3_i32 : i32
    %39 = arith.index_cast %38 : i32 to index
    %40 = memref.load %arg4[%39] : memref<8xf32, #tpu.memory_space<smem>>
    %41 = arith.mulf %4, %40 : f32
    %42 = arith.addf %41, %5 : f32
    %43 = math.tanh %37 : vector<1x128xf32>
    %44 = vector.broadcast %3 : f32 to vector<1x128xf32>
    %45 = arith.mulf %44, %43 : vector<1x128xf32>
    %46 = vector.broadcast %42 : f32 to vector<1x128xf32>
    %47 = arith.addf %45, %46 : vector<1x128xf32>
    %c4_i32 = arith.constant 4 : i32
    %48 = arith.addi %6, %c4_i32 : i32
    %49 = arith.index_cast %48 : i32 to index
    %50 = memref.load %arg4[%49] : memref<8xf32, #tpu.memory_space<smem>>
    %51 = arith.mulf %4, %50 : f32
    %52 = arith.addf %51, %5 : f32
    %53 = math.tanh %47 : vector<1x128xf32>
    %54 = vector.broadcast %3 : f32 to vector<1x128xf32>
    %55 = arith.mulf %54, %53 : vector<1x128xf32>
    %56 = vector.broadcast %52 : f32 to vector<1x128xf32>
    %57 = arith.addf %55, %56 : vector<1x128xf32>
    %c5_i32 = arith.constant 5 : i32
    %58 = arith.addi %6, %c5_i32 : i32
    %59 = arith.index_cast %58 : i32 to index
    %60 = memref.load %arg4[%59] : memref<8xf32, #tpu.memory_space<smem>>
    %61 = arith.mulf %4, %60 : f32
    %62 = arith.addf %61, %5 : f32
    %63 = math.tanh %57 : vector<1x128xf32>
    %64 = vector.broadcast %3 : f32 to vector<1x128xf32>
    %65 = arith.mulf %64, %63 : vector<1x128xf32>
    %66 = vector.broadcast %62 : f32 to vector<1x128xf32>
    %67 = arith.addf %65, %66 : vector<1x128xf32>
    %c6_i32 = arith.constant 6 : i32
    %68 = arith.addi %6, %c6_i32 : i32
    %69 = arith.index_cast %68 : i32 to index
    %70 = memref.load %arg4[%69] : memref<8xf32, #tpu.memory_space<smem>>
    %71 = arith.mulf %4, %70 : f32
    %72 = arith.addf %71, %5 : f32
    %73 = math.tanh %67 : vector<1x128xf32>
    %74 = vector.broadcast %3 : f32 to vector<1x128xf32>
    %75 = arith.mulf %74, %73 : vector<1x128xf32>
    %76 = vector.broadcast %72 : f32 to vector<1x128xf32>
    %77 = arith.addf %75, %76 : vector<1x128xf32>
    %c7_i32 = arith.constant 7 : i32
    %78 = arith.addi %6, %c7_i32 : i32
    %79 = arith.index_cast %78 : i32 to index
    %80 = memref.load %arg4[%79] : memref<8xf32, #tpu.memory_space<smem>>
    %81 = arith.mulf %4, %80 : f32
    %82 = arith.addf %81, %5 : f32
    %83 = math.tanh %77 : vector<1x128xf32>
    %84 = vector.broadcast %3 : f32 to vector<1x128xf32>
    %85 = arith.mulf %84, %83 : vector<1x128xf32>
    %86 = vector.broadcast %82 : f32 to vector<1x128xf32>
    %87 = arith.addf %85, %86 : vector<1x128xf32>
    %c0_6 = arith.constant 0 : index
    %c0_7 = arith.constant 0 : index
    %88 = vector.load %arg6[%c0_6, %c0_7] : memref<1x128xf32, #tpu.memory_space<vmem>>, vector<1x128xf32>
    tpu.vector_store %arg6[%c0_6, %c0_7], %87 {strides = array<i32>} : memref<1x128xf32, #tpu.memory_space<vmem>>, vector<1x128xf32>,
    %89 = tpu.concatenate %17, %27, %37, %47, %57, %67, %77, %87 in 0 : vector<1x128xf32>, vector<1x128xf32>, vector<1x128xf32>, vector<1x128xf32>, vector<1x128xf32>, vector<1x128xf32>, vector<1x128xf32>, vector<1x128xf32> -> vector<8x128xf32>
    %c0_8 = arith.constant 0 : index
    %c0_9 = arith.constant 0 : index
    %90 = vector.load %arg5[%c0_8, %c0_9] : memref<8x128xf32, #tpu.memory_space<vmem>>, vector<8x128xf32>
    tpu.vector_store %arg5[%c0_8, %c0_9], %89 {strides = array<i32>} : memref<8x128xf32, #tpu.memory_space<vmem>>, vector<8x128xf32>,
    return
  }
  func.func @transform_0(%arg0: i32) -> i32 {
    %c0_i32 = arith.constant 0 : i32
    %c0_i32_0 = arith.constant 0 : i32
    return %c0_i32 : i32
  }
  func.func @transform_1(%arg0: i32) -> i32 {
    %c0_i32 = arith.constant 0 : i32
    %c0_i32_0 = arith.constant 0 : i32
    return %c0_i32 : i32
  }
  func.func @transform_2(%arg0: i32) -> i32 {
    %c0_i32 = arith.constant 0 : i32
    %c0_i32_0 = arith.constant 0 : i32
    return %c0_i32 : i32
  }
  func.func @transform_3(%arg0: i32) -> i32 {
    %c0_i32 = arith.constant 0 : i32
    %c0_i32_0 = arith.constant 0 : i32
    return %c0_i32 : i32
  }
  func.func @transform_4(%arg0: i32) -> (i32, i32) {
    %c0_i32 = arith.constant 0 : i32
    %c0_i32_0 = arith.constant 0 : i32
    return %arg0, %c0_i32 : i32, i32
  }
}

</mosaic_0001>

<bundles_post_ra>
// kernel: tpu_custom_call.1
= control target key start
LH: loop header
LB: loop body
LE: loop exit
PB: predicated region body
PF: predicated region fallthrough
CT: control target
= control target key end

     0   :  { %12 = vsyncpa [#allocation8], 0  ;;  %s358_s0 = inlined_call_operand.<no memory space> [shape: f32[1], index: 0, kind: input, shape index: {}]   ;;  %s359_s1 = inlined_call_operand.<no memory space> [shape: f32[1], index: 1, kind: input, shape index: {}]   ;;  %s360_s2 = inlined_call_operand.<no memory space> [shape: f32[1], index: 2, kind: input, shape index: {}]   ;;  %s361_s3 = inlined_call_operand.vmem [shape: f32[8], index: 3, kind: input, shape index: {}]   ;;  %s362_s4 = inlined_call_operand.hbm [shape: f32[8,128], index: 4, kind: output, shape index: {}]  }
   0x1   :  { %13 = vsyncpa [#allocation7], 0  ;;  %s26_s17 = sshll.u32 %s361_s3, 4  ;;  %s27_s17 = int_to_ptr.vmem [resolvable:$true] %s26_s17 }
   0x2   :  { %s207_s18 = scalar_lea.vmem %s27_s17, 16  ;;  %p212_p1 = scmp.lt.s32.totalorder %s27_s17, %s27_s17 }
   0x3   :  { %p208_p0 = scmp.ne.s32.totalorder %s27_s17, %s207_s18  ;;  %p213_p2 = scmp.lt.s32.totalorder %s207_s18, %s207_s18 }
   0x5   :  { %p214_p3 = por %p213_p2, %p212_p1 }
   0x7   :  { %p215_p4 = pnand %p214_p3, %p208_p0 }
   0x9   :  { %218 = shalt.err (!%p215_p4)
}
   0xa   :  { %s245_s19 = smov [#allocation6]  }
   0xb   :  { %29 = dma.vmem_to_smem %s27_s17, 16, %s245_s19, [#allocation8]  }
   0xc   :  { %241 = dma.done.wait [#allocation8], 16  }
   0xd   :  { %242 = vsyncadd [#allocation8], 4294967280 }
   0xe   :  { %33 = sfence }
   0xf   :  { %v246_v0 = vmov 0.0   ;;  %s44_s20 = sld [smem:[#allocation6]]  ;;  %v285_v2 = vstv %s358_s0  ;;  %s181_s28 = sld [smem:[#allocation6 + $0x1]]  ;;  %v110_v7 = vlaneseq  ;;  %vm151_vm0 = vcmask 1040384  }
  0x10   :  { %38 = vst [vmem:[#allocation2] sm:$0x1] %v246_v0  ;;  %s182_s9 = sld [smem:[#allocation6 + $0x2]]  ;;  %s183_s15 = sld [smem:[#allocation6 + $0x3]]  ;;  %vm153_vm1 = vcmask 1041408   ;;  %vm155_vm2 = vcmask 1042432  }
  0x11   :  { %v111_v8 = vshrl.u32 %v110_v7, 7  ;;  %s184_s3 = sld [smem:[#allocation6 + $0x4]]  ;;  %vm157_vm3 = vcmask 1043456   ;;  %vm159_vm4 = vcmask 1044480   ;;  %vm161_vm5 = vcmask 1045504  }
  0x12   :  { %vm163_vm6 = vcmask 1046528  }
  0x13   :  { %v295_v12 = vsub.s32 0, %v111_v8 }
  0x15   :  { %s45_s22 = smul.f32 %s44_s20, %s359_s1 }
  0x16   :  { %s54_s5 = smul.f32 %s181_s28, %s359_s1  ;;  %s185_s28 = sld [smem:[#allocation6 + $0x5]] }
  0x17   :  { %v43_v1 = vld [vmem:[#allocation2] sm:$0x1]  ;;  %s46_s25 = sadd.f32 %s45_s22, %s360_s2  ;;  %s62_s11 = smul.f32 %s182_s9, %s359_s1 }
  0x18   :  { %191 = vtanh.f32 %v43_v1  ;;  %s55_s8 = sadd.f32 %s54_s5, %s360_s2  ;;  %s70_s18 = smul.f32 %s183_s15, %s359_s1 }
  0x19   :  { %v50_v4 = vstv %s46_s25  ;;  %s63_s14 = sadd.f32 %s62_s11, %s360_s2  ;;  %s78_s24 = smul.f32 %s184_s3, %s359_s1 }
  0x1a   :  { %v58_v10 = vstv %s55_s8  ;;  %s71_s21 = sadd.f32 %s70_s18, %s360_s2  ;;  %s186_s9 = sld [smem:[#allocation6 + $0x6]] }
  0x1b   :  { %v66_v17 = vstv %s63_s14  ;;  %s79_s27 = sadd.f32 %s78_s24, %s360_s2  ;;  %s187_s15 = sld [smem:[#allocation6 + $0x7]] }
  0x1c   :  { %v74_v23 = vstv %s71_s21  ;;  %s86_s5 = smul.f32 %s185_s28, %s359_s1 }
  0x1d   :  { %v82_v27 = vstv %s79_s27 }
  0x1e   :  { %s87_s8 = sadd.f32 %s86_s5, %s360_s2 }
  0x20   :  { %v90_v31 = vstv %s87_s8  ;;  %s94_s11 = smul.f32 %s186_s9, %s359_s1 }
  0x21   :  { %s102_s18 = smul.f32 %s187_s15, %s359_s1  ;;  %s247_s1 = smov [#allocation9]  }
  0x22   :  { %v192_v3 = vpop.eup %191  ;;  %s95_s14 = sadd.f32 %s94_s11, %s360_s2 }
  0x23   :  { %v49_v5 = vmul.f32 %v192_v3, %v285_v2  ;;  %s103_s21 = sadd.f32 %s102_s18, %s360_s2  ;;  %s172_s2 = sshll.u32 %s247_s1, 4  ;;  %s173_s2 = int_to_ptr.vmem [resolvable:$true] %s172_s2 }
  0x24   :  { %v98_v35 = vstv %s95_s14  ;;  %s219_s3 = scalar_lea.vmem %s173_s2, 128  ;;  %p224_p6 = scmp.lt.s32.totalorder %s173_s2, %s173_s2 }
  0x25   :  { %v51_v6 = vadd.f32 %v50_v4, %v49_v5  ;;  %v106_v40 = vstv %s103_s21  ;;  %p220_p5 = scmp.ne.s32.totalorder %s173_s2, %s219_s3  ;;  %p225_p7 = scmp.lt.s32.totalorder %s219_s3, %s219_s3 }
  0x27   :  { %193 = vtanh.f32 %v51_v6  ;;  %p226_p8 = por %p225_p7, %p224_p6 }
  0x29   :  { %p227_p9 = pnand %p226_p8, %p220_p5 }
  0x31   :  { %v194_v9 = vpop.eup %193 }
  0x32   :  { %v57_v11 = vmul.f32 %v194_v9, %v285_v2 }
  0x34   :  { %v59_v13 = vadd.f32 %v58_v10, %v57_v11 }
  0x36   :  { %195 = vtanh.f32 %v59_v13  ;;  %v113_v14 = vrot.slane %v59_v13, %v295_v12 }
  0x38   :  { %v152_v15 = vsel %vm151_vm0, %v51_v6, %v113_v14 }
  0x40   :  { %v196_v16 = vpop.eup %195 }
  0x41   :  { %v65_v18 = vmul.f32 %v196_v16, %v285_v2 }
  0x43   :  { %v67_v19 = vadd.f32 %v66_v17, %v65_v18 }
  0x45   :  { %197 = vtanh.f32 %v67_v19  ;;  %v119_v20 = vrot.slane %v67_v19, %v295_v12 }
  0x47   :  { %v154_v21 = vsel %vm153_vm1, %v152_v15, %v119_v20 }
  0x4f   :  { %v198_v22 = vpop.eup %197 }
  0x50   :  { %v73_v24 = vmul.f32 %v198_v22, %v285_v2 }
  0x52   :  { %v75_v25 = vadd.f32 %v74_v23, %v73_v24 }
  0x54   :  { %199 = vtanh.f32 %v75_v25  ;;  %v125_v38 = vrot.slane %v75_v25, %v295_v12 }
  0x56   :  { %v156_v46 = vsel %vm155_vm2, %v154_v21, %v125_v38 }
  0x5e   :  { %v200_v26 = vpop.eup %199 }
  0x5f   :  { %v81_v28 = vmul.f32 %v200_v26, %v285_v2 }
  0x61   :  { %v83_v29 = vadd.f32 %v82_v27, %v81_v28 }
  0x63   :  { %201 = vtanh.f32 %v83_v29  ;;  %v131_v41 = vrot.slane %v83_v29, %v295_v12 }
  0x65   :  { %v158_v47 = vsel %vm157_vm3, %v156_v46, %v131_v41 }
  0x6d   :  { %v202_v30 = vpop.eup %201 }
  0x6e   :  { %v89_v32 = vmul.f32 %v202_v30, %v285_v2 }
  0x70   :  { %v91_v33 = vadd.f32 %v90_v31, %v89_v32 }
  0x72   :  { %203 = vtanh.f32 %v91_v33  ;;  %v137_v43 = vrot.slane %v91_v33, %v295_v12 }
  0x74   :  { %v160_v49 = vsel %vm159_vm4, %v158_v47, %v137_v43 }
  0x7c   :  { %v204_v34 = vpop.eup %203 }
  0x7d   :  { %v97_v36 = vmul.f32 %v204_v34, %v285_v2 }
  0x7f   :  { %v99_v37 = vadd.f32 %v98_v35, %v97_v36 }
  0x81   :  { %205 = vtanh.f32 %v99_v37  ;;  %v143_v44 = vrot.slane %v99_v37, %v295_v12 }
  0x83   :  { %v162_v50 = vsel %vm161_vm5, %v160_v49, %v143_v44 }
  0x8b   :  { %v206_v39 = vpop.eup %205 }
  0x8c   :  { %v105_v42 = vmul.f32 %v206_v39, %v285_v2 }
  0x8e   :  { %v107_v45 = vadd.f32 %v106_v40, %v105_v42 }
  0x90   :  { %108 = vst [vmem:[#allocation2] sm:$0x1] %v107_v45  ;;  %v149_v48 = vrot.slane %v107_v45, %v295_v12 }
  0x92   :  { %v164_v51 = vsel %vm163_vm6, %v162_v50, %v149_v48 }
  0x93   :  { %165 = vst [vmem:[#allocation9] sm:$0xff] %v164_v51 }
  0x94   :  { %230 = shalt.err (!%p227_p9)
}
  0x95   :  { %s231_s24 = scalar_lea.hbm %s362_s4, 128 }
  0x96   :  { %p232_p10 = scmp.ne.s32.totalorder %s362_s4, %s231_s24  ;;  %p235_p11 = scmp.lt.u32.totalorder %s231_s24, %s362_s4 }
  0x98   :  { %p237_p12 = pnand %p235_p11, %p232_p10 }
  0x9a   :  { %240 = shalt.err (!%p237_p12)
}
  0x9b   :  { %175 = dma.vmem_to_hbm [thread:$0]  %s173_s2, 128, %s362_s4, [#allocation7]  }
  0x9c   :  { %243 = dma.done.wait [#allocation7], 128  }
  0x9d   :  { %244 = vsyncadd [#allocation7], 4294967168 }
  0x9e   :  { %179 = vsyncpa [#allocation7], 1 }
  0x9f   :  { %180 = vsyncpa [#allocation8], 1 }

</bundles_post_ra>
